<compile_context>
chip_gen: v5e
topology: v5e:2x2
jax: 0.10.0
libtpu: 0.0.40
codegen_flags: <defaults>
</compile_context>

<pallas_src>
import functools

import jax
import jax.numpy as jnp
from jax.experimental import pallas as pl
from jax.experimental.pallas import tpu as pltpu


# -----------------------------------------------------------------------------
# Kernel (one batch tile, feature-major: batch on the lane axis)
# -----------------------------------------------------------------------------
def nn_sc1_kernel(alpha_ref,            # SMEM (1,)               scalar alpha
                  x_ref,                # (n_input,  TB)          input tile
                  w0_ref, b0_ref,       # (n_hidden, n_input),  (n_hidden, 1)
                  w1_ref, b1_ref,       # (n_hidden, n_hidden), (n_hidden, 1)
                  w2_ref, b2_ref,       # (n_hidden, n_hidden), (n_hidden, 1)
                  we_ref, be_ref,       # (n_output, n_hidden), (n_output, 1)
                  o_ref,                # (n_output, TB)
                  *, bf16_act):
    act_dtype = jnp.bfloat16 if bf16_act else jnp.float32
    alpha = alpha_ref[0]

    # x = exp(alpha * x)                                  (n_input, TB), lane-dense, f32 EUP
    h = jnp.exp(alpha * x_ref[...]).astype(act_dtype)

    # fcs + fch: tanh(W @ h + b), unrolled for n_layers = 3
    for w_ref, b_ref in ((w0_ref, b0_ref), (w1_ref, b1_ref), (w2_ref, b2_ref)):
        pre = jnp.dot(w_ref[...], h, preferred_element_type=jnp.float32) + b_ref[...]
        h = jnp.tanh(pre.astype(act_dtype))               # bf16 tanh on v6e/v7x if enabled

    # fce: We @ h + be (kept f32)                         (n_output, TB)
    out = jnp.dot(we_ref[...], h.astype(jnp.float32),
                  preferred_element_type=jnp.float32) + be_ref[...]
    o_ref[...] = out.astype(o_ref.dtype)


# -----------------------------------------------------------------------------
# Wrapper
# -----------------------------------------------------------------------------
@functools.partial(jax.jit,
                   static_argnames=("tile_b", "bf16_act", "feature_major"))
def _nn_sc1_forward_impl(x, alpha, w0, b0, w1, b1, w2, b2, we, be,
                         tile_b, bf16_act, feature_major):
    out_dtype = x.dtype
    if feature_major:
        xT = x.astype(jnp.float32)            # already (n_input, B): zero wrapper copies
    else:
        xT = x.astype(jnp.float32).T          # single transpose copy; no pad (ragged last block)
    n_input, B = xT.shape
    n_hidden = w0.shape[0]
    n_output = we.shape[0]
    n_tiles = pl.cdiv(B, tile_b)

    # Biases as (features, 1) columns for a clean 2-D broadcast in the kernel.
    b0c = b0.reshape(n_hidden, 1).astype(jnp.float32)
    b1c = b1.reshape(n_hidden, 1).astype(jnp.float32)
    b2c = b2.reshape(n_hidden, 1).astype(jnp.float32)
    bec = be.reshape(n_output, 1).astype(jnp.float32)

    # bf16 activation path feeds bf16 weights to the MXU (f32 accumulate).
    w_dtype = jnp.bfloat16 if bf16_act else jnp.float32
    w0k = w0.astype(w_dtype)
    w1k = w1.astype(w_dtype)
    w2k = w2.astype(w_dtype)
    wek = we.astype(jnp.float32)

    # Constant block index => the pipeline DMAs each weight/bias exactly once.
    full = lambda shape: pl.BlockSpec(shape, lambda i: (0, 0))

    n_weights = w0.size + w1.size + w2.size + we.size
    cost = pl.CostEstimate(
        flops=2 * B * n_weights,
        transcendentals=B * (n_input + 3 * n_hidden),
        bytes_accessed=(B * (n_input + n_output) * 4
                        + 4 * (n_weights + 3 * n_hidden + n_output)),
    )

    oT = pl.pallas_call(
        functools.partial(nn_sc1_kernel, bf16_act=bf16_act),
        out_shape=jax.ShapeDtypeStruct((n_output, B), out_dtype),
        grid_spec=pltpu.PrefetchScalarGridSpec(
            num_scalar_prefetch=0,
            grid=(n_tiles,),
            in_specs=[
                pl.BlockSpec(memory_space=pltpu.MemorySpace.SMEM),       # alpha
                pl.BlockSpec((n_input, tile_b), lambda i: (0, i)),       # x tile
                full((n_hidden, n_input)),  full((n_hidden, 1)),         # fcs
                full((n_hidden, n_hidden)), full((n_hidden, 1)),         # fch[0]
                full((n_hidden, n_hidden)), full((n_hidden, 1)),         # fch[1]
                full((n_output, n_hidden)), full((n_output, 1)),         # fce
            ],
            out_specs=pl.BlockSpec((n_output, tile_b), lambda i: (0, i)),
        ),
        compiler_params=pltpu.CompilerParams(
            dimension_semantics=("parallel",),
            vmem_limit_bytes=32 * 1024 * 1024),
        cost_estimate=cost,
    )(alpha, xT, w0k, b0c, w1k, b1c, w2k, b2c, wek, bec)

    # Back to the (B, n_output) contract unless the caller asked for feature-major.
    return oT if feature_major else oT.T


def _choose_tile(batch, cap=8192):
    """Batch tile: full-dim tile for small batches; otherwise a multiple of 128
    chosen so each tile is <= cap and the grid has an EVEN number of steps
    (balances v7x's two TensorCores on the 'parallel' batch axis)."""
    if batch <= 1024:
        return int(batch)                         # one full-array block, always legal
    chunks = pl.cdiv(batch, 128)                  # 128-lane groups
    n_tiles = max(2, 2 * pl.cdiv(chunks * 128, 2 * cap))   # even, each tile <= cap
    return int(128 * pl.cdiv(chunks, n_tiles))


def nn_sc1_forward(x, alpha, w0, b0, w1, b1, w2, b2, we, be, *,
                   tile_b=None, bf16_act=False, feature_major=False):
    """x: (B, n_input) (or (n_input, B) if feature_major=True); weights in
    PyTorch layout (out_features, in_features), biases (out_features,).
    Returns (B, n_output) (or (n_output, B) if feature_major=True)."""
    batch = x.shape[1] if feature_major else x.shape[0]
    if tile_b is None:
        tile_b = _choose_tile(batch)
    return _nn_sc1_forward_impl(x, alpha, w0, b0, w1, b1, w2, b2, we, be,
                                tile_b, bf16_act, feature_major)


# -----------------------------------------------------------------------------
# Deterministic parameter init (mimics nn.Linear uniform init, PyTorch layout)
# -----------------------------------------------------------------------------
def init_linear(key, fan_in, fan_out):
    kw, kb = jax.random.split(key)
    bound = 1.0 / jnp.sqrt(fan_in)
    w = jax.random.uniform(kw, (fan_out, fan_in), jnp.float32, -bound, bound)
    b = jax.random.uniform(kb, (fan_out,), jnp.float32, -bound, bound)
    return w, b


def reference_forward(x, alpha, w0, b0, w1, b1, w2, b2, we, be):
    h = jnp.exp(alpha[0] * x)
    h = jnp.tanh(h @ w0.T + b0)
    h = jnp.tanh(h @ w1.T + b1)
    h = jnp.tanh(h @ w2.T + b2)
    return h @ we.T + be


if __name__ == "__main__":
    # Module config: n_input=4, n_hidden=32, n_output=2, n_layers=3
    n_input, n_hidden, n_output = 4, 32, 2

    key = jax.random.PRNGKey(0)
    kx, k0, k1, k2, ke = jax.random.split(key, 5)

    alpha = jnp.ones((1,), jnp.float32)                  # nn.Parameter(torch.ones(1))
    w0, b0 = init_linear(k0, n_input, n_hidden)          # fcs
    w1, b1 = init_linear(k1, n_hidden, n_hidden)         # fch layer 1
    w2, b2 = init_linear(k2, n_hidden, n_hidden)         # fch layer 2
    we, be = init_linear(ke, n_hidden, n_output)         # fce
    params = (alpha, w0, b0, w1, b1, w2, b2, we, be)

    ok = True

    # 1) Small batch: single full-dim tile, default (B, n_input) contract.
    x = jax.random.normal(kx, (100, n_input), jnp.float32) * 0.5
    out = jax.block_until_ready(nn_sc1_forward(x, *params))
    ref = reference_forward(x, *params)
    ok &= out.shape == (100, n_output)
    ok &= bool(jnp.allclose(out, ref, atol=1e-5, rtol=1e-5))

    # 2) Multi-tile grid with a ragged (masked) last block, no padding.
    x = jax.random.normal(kx, (600, n_input), jnp.float32) * 0.5
    out = jax.block_until_ready(nn_sc1_forward(x, *params, tile_b=256))
    ref = reference_forward(x, *params)
    ok &= out.shape == (600, n_output)
    ok &= bool(jnp.allclose(out, ref, atol=1e-5, rtol=1e-5))

    # 3) Feature-major API (zero wrapper transposes) + bf16 tanh path
    #    (intended for v6e/v7x; compiles everywhere, looser tolerance).
    outT = jax.block_until_ready(
        nn_sc1_forward(x.T, *params, tile_b=256, bf16_act=True, feature_major=True))
    ok &= outT.shape == (n_output, 600)
    ok &= bool(jnp.allclose(outT, ref.T, atol=5e-2, rtol=5e-2))

    assert ok, "mismatch vs reference"
    print("KERNEL_OK")
</pallas_src>

<mosaic_0001>
module attributes {stable_mosaic.version = 11 : i64} {
  func.func @nn_sc1_kernel(%arg0: i32, %arg1: memref<1xf32, #tpu.memory_space<smem>>, %arg2: memref<4x100xf32, #tpu.memory_space<vmem>>, %arg3: memref<32x4xf32, #tpu.memory_space<vmem>>, %arg4: memref<32x1xf32, #tpu.memory_space<vmem>>, %arg5: memref<32x32xf32, #tpu.memory_space<vmem>>, %arg6: memref<32x1xf32, #tpu.memory_space<vmem>>, %arg7: memref<32x32xf32, #tpu.memory_space<vmem>>, %arg8: memref<32x1xf32, #tpu.memory_space<vmem>>, %arg9: memref<2x32xf32, #tpu.memory_space<vmem>>, %arg10: memref<2x1xf32, #tpu.memory_space<vmem>>, %arg11: memref<2x100xf32, #tpu.memory_space<vmem>>) attributes {dimension_semantics = [#tpu.dimension_semantics<parallel>], iteration_bounds = array<i64: 1>, scalar_prefetch = 0 : i64, scratch_operands = 0 : i64, tpu.core_type = #tpu.core_type<tc>, window_params = [{transform_indices = @transform_0, window_bounds = array<i64: 1>}, {transform_indices = @transform_1, window_bounds = array<i64: 4, 100>}, {pipeline_mode = #tpu.pipeline_mode<synchronous>, transform_indices = @transform_2, window_bounds = array<i64: 32, 4>}, {pipeline_mode = #tpu.pipeline_mode<synchronous>, transform_indices = @transform_3, window_bounds = array<i64: 32, 1>}, {pipeline_mode = #tpu.pipeline_mode<synchronous>, transform_indices = @transform_4, window_bounds = array<i64: 32, 32>}, {pipeline_mode = #tpu.pipeline_mode<synchronous>, transform_indices = @transform_5, window_bounds = array<i64: 32, 1>}, {pipeline_mode = #tpu.pipeline_mode<synchronous>, transform_indices = @transform_6, window_bounds = array<i64: 32, 32>}, {pipeline_mode = #tpu.pipeline_mode<synchronous>, transform_indices = @transform_7, window_bounds = array<i64: 32, 1>}, {pipeline_mode = #tpu.pipeline_mode<synchronous>, transform_indices = @transform_8, window_bounds = array<i64: 2, 32>}, {pipeline_mode = #tpu.pipeline_mode<synchronous>, transform_indices = @transform_9, window_bounds = array<i64: 2, 1>}, {transform_indices = @transform_10, window_bounds = array<i64: 2, 100>}]} {
    %c0 = arith.constant 0 : index
    %0 = memref.load %arg1[%c0] : memref<1xf32, #tpu.memory_space<smem>>
    %c0_0 = arith.constant 0 : index
    %c0_1 = arith.constant 0 : index
    %1 = vector.load %arg2[%c0_0, %c0_1] : memref<4x100xf32, #tpu.memory_space<vmem>>, vector<4x100xf32>
    %2 = vector.broadcast %0 : f32 to vector<4x100xf32>
    %3 = arith.mulf %2, %1 : vector<4x100xf32>
    %4 = math.exp %3 : vector<4x100xf32>
    %c0_2 = arith.constant 0 : index
    %c0_3 = arith.constant 0 : index
    %5 = vector.load %arg3[%c0_2, %c0_3] : memref<32x4xf32, #tpu.memory_space<vmem>>, vector<32x4xf32>
    %cst = arith.constant dense<0.000000e+00> : vector<32x100xf32>
    %6 = tpu.matmul %5, %4, %cst {dimension_numbers = #tpu.dot_dimension_numbers<[1], [0], [0], [1], [0, 0, 1, 1], [], []>} : vector<32x4xf32>, vector<4x100xf32>, vector<32x100xf32> -> vector<32x100xf32>
    %c0_4 = arith.constant 0 : index
    %c0_5 = arith.constant 0 : index
    %7 = vector.load %arg4[%c0_4, %c0_5] : memref<32x1xf32, #tpu.memory_space<vmem>>, vector<32x1xf32>
    %8 = vector.broadcast %7 : vector<32x1xf32> to vector<32x100xf32>
    %9 = arith.addf %6, %8 : vector<32x100xf32>
    %10 = math.tanh %9 : vector<32x100xf32>
    %c0_6 = arith.constant 0 : index
    %c0_7 = arith.constant 0 : index
    %11 = vector.load %arg5[%c0_6, %c0_7] : memref<32x32xf32, #tpu.memory_space<vmem>>, vector<32x32xf32>
    %cst_8 = arith.constant dense<0.000000e+00> : vector<32x100xf32>
    %12 = tpu.matmul %11, %10, %cst_8 {dimension_numbers = #tpu.dot_dimension_numbers<[1], [0], [0], [1], [0, 0, 1, 1], [], []>} : vector<32x32xf32>, vector<32x100xf32>, vector<32x100xf32> -> vector<32x100xf32>
    %c0_9 = arith.constant 0 : index
    %c0_10 = arith.constant 0 : index
    %13 = vector.load %arg6[%c0_9, %c0_10] : memref<32x1xf32, #tpu.memory_space<vmem>>, vector<32x1xf32>
    %14 = vector.broadcast %13 : vector<32x1xf32> to vector<32x100xf32>
    %15 = arith.addf %12, %14 : vector<32x100xf32>
    %16 = math.tanh %15 : vector<32x100xf32>
    %c0_11 = arith.constant 0 : index
    %c0_12 = arith.constant 0 : index
    %17 = vector.load %arg7[%c0_11, %c0_12] : memref<32x32xf32, #tpu.memory_space<vmem>>, vector<32x32xf32>
    %cst_13 = arith.constant dense<0.000000e+00> : vector<32x100xf32>
    %18 = tpu.matmul %17, %16, %cst_13 {dimension_numbers = #tpu.dot_dimension_numbers<[1], [0], [0], [1], [0, 0, 1, 1], [], []>} : vector<32x32xf32>, vector<32x100xf32>, vector<32x100xf32> -> vector<32x100xf32>
    %c0_14 = arith.constant 0 : index
    %c0_15 = arith.constant 0 : index
    %19 = vector.load %arg8[%c0_14, %c0_15] : memref<32x1xf32, #tpu.memory_space<vmem>>, vector<32x1xf32>
    %20 = vector.broadcast %19 : vector<32x1xf32> to vector<32x100xf32>
    %21 = arith.addf %18, %20 : vector<32x100xf32>
    %22 = math.tanh %21 : vector<32x100xf32>
    %c0_16 = arith.constant 0 : index
    %c0_17 = arith.constant 0 : index
    %23 = vector.load %arg9[%c0_16, %c0_17] : memref<2x32xf32, #tpu.memory_space<vmem>>, vector<2x32xf32>
    %cst_18 = arith.constant dense<0.000000e+00> : vector<2x100xf32>
    %24 = tpu.matmul %23, %22, %cst_18 {dimension_numbers = #tpu.dot_dimension_numbers<[1], [0], [0], [1], [0, 0, 1, 1], [], []>} : vector<2x32xf32>, vector<32x100xf32>, vector<2x100xf32> -> vector<2x100xf32>
    %c0_19 = arith.constant 0 : index
    %c0_20 = arith.constant 0 : index
    %25 = vector.load %arg10[%c0_19, %c0_20] : memref<2x1xf32, #tpu.memory_space<vmem>>, vector<2x1xf32>
    %26 = vector.broadcast %25 : vector<2x1xf32> to vector<2x100xf32>
    %27 = arith.addf %24, %26 : vector<2x100xf32>
    %c0_21 = arith.constant 0 : index
    %c0_22 = arith.constant 0 : index
    %28 = vector.load %arg11[%c0_21, %c0_22] : memref<2x100xf32, #tpu.memory_space<vmem>>, vector<2x100xf32>
    tpu.vector_store %arg11[%c0_21, %c0_22], %27 {strides = array<i32>} : memref<2x100xf32, #tpu.memory_space<vmem>>, vector<2x100xf32>,
    return
  }
  func.func @transform_0(%arg0: i32) -> i32 {
    %c0_i32 = arith.constant 0 : i32
    %c0_i32_0 = arith.constant 0 : i32
    return %c0_i32 : i32
  }
  func.func @transform_1(%arg0: i32) -> (i32, i32) {
    %c0_i32 = arith.constant 0 : i32
    %c0_i32_0 = arith.constant 0 : i32
    return %c0_i32, %arg0 : i32, i32
  }
  func.func @transform_2(%arg0: i32) -> (i32, i32) {
    %c0_i32 = arith.constant 0 : i32
    %c0_i32_0 = arith.constant 0 : i32
    %c0_i32_1 = arith.constant 0 : i32
    return %c0_i32, %c0_i32_0 : i32, i32
  }
  func.func @transform_3(%arg0: i32) -> (i32, i32) {
    %c0_i32 = arith.constant 0 : i32
    %c0_i32_0 = arith.constant 0 : i32
    %c0_i32_1 = arith.constant 0 : i32
    return %c0_i32, %c0_i32_0 : i32, i32
  }
  func.func @transform_4(%arg0: i32) -> (i32, i32) {
    %c0_i32 = arith.constant 0 : i32
    %c0_i32_0 = arith.constant 0 : i32
    %c0_i32_1 = arith.constant 0 : i32
    return %c0_i32, %c0_i32_0 : i32, i32
  }
  func.func @transform_5(%arg0: i32) -> (i32, i32) {
    %c0_i32 = arith.constant 0 : i32
    %c0_i32_0 = arith.constant 0 : i32
    %c0_i32_1 = arith.constant 0 : i32
    return %c0_i32, %c0_i32_0 : i32, i32
  }
  func.func @transform_6(%arg0: i32) -> (i32, i32) {
    %c0_i32 = arith.constant 0 : i32
    %c0_i32_0 = arith.constant 0 : i32
    %c0_i32_1 = arith.constant 0 : i32
    return %c0_i32, %c0_i32_0 : i32, i32
  }
  func.func @transform_7(%arg0: i32) -> (i32, i32) {
    %c0_i32 = arith.constant 0 : i32
    %c0_i32_0 = arith.constant 0 : i32
    %c0_i32_1 = arith.constant 0 : i32
    return %c0_i32, %c0_i32_0 : i32, i32
  }
  func.func @transform_8(%arg0: i32) -> (i32, i32) {
    %c0_i32 = arith.constant 0 : i32
    %c0_i32_0 = arith.constant 0 : i32
    %c0_i32_1 = arith.constant 0 : i32
    return %c0_i32, %c0_i32_0 : i32, i32
  }
  func.func @transform_9(%arg0: i32) -> (i32, i32) {
    %c0_i32 = arith.constant 0 : i32
    %c0_i32_0 = arith.constant 0 : i32
    %c0_i32_1 = arith.constant 0 : i32
    return %c0_i32, %c0_i32_0 : i32, i32
  }
  func.func @transform_10(%arg0: i32) -> (i32, i32) {
    %c0_i32 = arith.constant 0 : i32
    %c0_i32_0 = arith.constant 0 : i32
    return %c0_i32, %arg0 : i32, i32
  }
}

</mosaic_0001>

<bundles_post_ra>
// kernel: _nn_sc1_forward_impl.1
= control target key start
LH: loop header
LB: loop body
LE: loop exit
PB: predicated region body
PF: predicated region fallthrough
CT: control target
= control target key end

     0   :  { %v395_v3 = vmov 0   ;;  %s552_s0 = inlined_call_operand.<no memory space> [shape: f32[1], index: 0, kind: input, shape index: {}]   ;;  %s553_s1 = inlined_call_operand.vmem [shape: f32[4,100], index: 1, kind: input, shape index: {}]   ;;  %s554_s2 = inlined_call_operand.vmem [shape: f32[32,4], index: 2, kind: input, shape index: {}]   ;;  %s555_s3 = inlined_call_operand.vmem [shape: f32[32,1], index: 3, kind: input, shape index: {}]   ;;  %s556_s4 = inlined_call_operand.vmem [shape: f32[32,32], index: 4, kind: input, shape index: {}]   ;;  %s557_s5 = inlined_call_operand.vmem [shape: f32[32,1], index: 5, kind: input, shape index: {}]   ;;  %s558_s6 = inlined_call_operand.vmem [shape: f32[32,32], index: 6, kind: input, shape index: {}]   ;;  %s559_s7 = inlined_call_operand.vmem [shape: f32[32,1], index: 7, kind: input, shape index: {}]   ;;  %s560_s8 = inlined_call_operand.vmem [shape: f32[2,32], index: 8, kind: input, shape index: {}]   ;;  %s561_s9 = inlined_call_operand.vmem [shape: f32[2,1], index: 9, kind: input, shape index: {}]   ;;  %s562_s10 = inlined_call_operand.hbm [shape: f32[2,100], index: 10, kind: output, shape index: {}]  }
   0x1   :  { %v50_v0 = vld [vmem:[%s555_s3 + $0x18] sm:$0xff]  ;;  %v38_v1 = vld [vmem:[%s553_s1] sm:$0xf]  ;;  %v39_v2 = vstv %s552_s0  ;;  %340 = vset.pattern.permute.xlu0 %v395_v3  ;;  %341 = vset.pattern.permute.xlu1 %v395_v3  ;;  %v48_v5 = vld [vmem:[%s555_s3 + $0x8] sm:$0xff] }
   0x2   :  { %v40_v4 = vmul.f32 %v39_v2, %v38_v1  ;;  %68 = vperm.xlu0 %340, %v50_v0   ;;  %58 = vperm.xlu1 %341, %v48_v5  }
   0x3   :  { %342 = vset.pattern.permute.xlu2 %v395_v3 }
   0x4   :  { %v41_v6 = vmul.f32 1.442695, %v40_v4 }
   0x5   :  { %16 = vsyncpa [#allocation4], 0  ;;  %v49_v7 = vld [vmem:[%s555_s3 + $0x10] sm:$0xff]  ;;  %v47_v8 = vld [vmem:[%s555_s3] sm:$0xff]  ;;  %vm84_vm0 = vcmask 1043456   ;;  %vm71_vm1 = vcmask 31744  }
   0x6   :  { %343 = vpow2.f32 %v41_v6  ;;  %v43_v9 = vld [vmem:[%s554_s2] sm:$0xff]  ;;  %v126_v11 = vld [vmem:[%s557_s5 + $0x8] sm:$0xff]  ;;  %v201_v14 = vld [vmem:[%s559_s7 + $0x10] sm:$0xff]  ;;  %vm149_vm2 = vcmask 261120   ;;  %s396_s17 = smov [#allocation3]   ;;  %s307_s21 = sshll.u32 %s562_s10, 4  ;;  %s308_s21 = int_to_ptr.hbm [resolvable:$true] %s307_s21 }
   0x7   :  { %v125_v12 = vld [vmem:[%s557_s5] sm:$0xff]  ;;  %v44_v13 = vld [vmem:[%s554_s2 + $0x8] sm:$0xff]  ;;  %v45_v16 = vld [vmem:[%s554_s2 + $0x10] sm:$0xff]  ;;  %s305_s18 = sshll.u32 %s396_s17, 4  ;;  %vm298_vm3 = vcmask 812032   ;;  %s306_s18 = int_to_ptr.vmem [resolvable:$true] %s305_s18 }
   0x8   :  { %v200_v15 = vld [vmem:[%s559_s7 + $0x8] sm:$0xff]  ;;  %v269_v17 = vld [vmem:[%s561_s9] sm:$0x3]  ;;  %v46_v18 = vld [vmem:[%s554_s2 + $0x18] sm:$0xff] }
   0x9   :  { %v128_v28 = vld [vmem:[%s557_s5 + $0x18] sm:$0xff]  ;;  %v127_v32 = vld [vmem:[%s557_s5 + $0x10] sm:$0xff]  ;;  %v121_v36 = vld [vmem:[%s556_s4] sm:$0xff] }
   0xa   :  { %63 = vperm.xlu0 %340, %v49_v7   ;;  %53 = vperm.xlu1 %341, %v47_v8   ;;  %v124_v37 = vld [vmem:[%s556_s4 + $0x18] sm:$0xff]  ;;  %v122_v40 = vld [vmem:[%s556_s4 + $0x8] sm:$0xff]  ;;  %v199_v41 = vld [vmem:[%s559_s7] sm:$0xff] }
   0xb   :  { %146 = vperm.xlu2 %342, %v128_v28   ;;  %v202_v39 = vld [vmem:[%s559_s7 + $0x18] sm:$0xff]  ;;  %v123_v42 = vld [vmem:[%s556_s4 + $0x10] sm:$0xff]  ;;  %v195_v58 = vld [vmem:[%s558_s6] sm:$0xff] }
   0xc   :  { %v344_v10 = vpop.eup %343  ;;  %v198_v59 = vld [vmem:[%s558_s6 + $0x18] sm:$0xff]  ;;  %v196_v61 = vld [vmem:[%s558_s6 + $0x8] sm:$0xff]  ;;  %v197_v62 = vld [vmem:[%s558_s6 + $0x10] sm:$0xff] }
   0xd   :  { %316 = vmatpush.msk.msra.mxu0 %vm84_vm0, %v344_v10 }
   0xe   :  { %317 = vmatmul.msk.f32.vlgmr.msra.gmra.mxu0 %vm71_vm1, %v43_v9 }
  0x12   :  { %136 = vperm.xlu0 %340, %v126_v11   ;;  %131 = vperm.xlu1 %341, %v125_v12  }
  0x13   :  { %141 = vperm.xlu2 %342, %v127_v32  }
  0x16   :  { %318 = vmatmul.msk.f32.gmra.mxu0 %vm71_vm1, %v44_v13 }
  0x1a   :  { %215 = vperm.xlu0 %340, %v201_v14   ;;  %210 = vperm.xlu1 %341, %v200_v15   ;;  %v268_v14 = vld [vmem:[%s560_s8] sm:$0x3] }
  0x1b   :  { %220 = vperm.xlu2 %342, %v202_v39  }
  0x1e   :  { %319 = vmatmul.msk.f32.gmra.mxu0 %vm71_vm1, %v45_v16 }
  0x22   :  { %272 = vperm.xlu0 %340, %v269_v17  }
  0x23   :  { %205 = vperm.xlu2 %342, %v199_v41  }
  0x26   :  { %320 = vmatmul.msk.f32.gmra.mxu0 %vm71_vm1, %v46_v18 }
  0x65   :  { %v147_v44 = vpop.permute.xlu2 %146 }
  0x6d   :  { %v142_v50 = vpop.permute.xlu2 %141 }
  0x74   :  { %v69_v21 = vpop.permute.xlu0 %68  ;;  %v59_v22 = vpop.permute.xlu1 %58 }
  0x75   :  { %v221_v63 = vpop.permute.xlu2 %220 }
  0x7c   :  { %v64_v24 = vpop.permute.xlu0 %63  ;;  %v54_v29 = vpop.permute.xlu1 %53 }
  0x7d   :  { %v206_v10 = vpop.permute.xlu2 %205 }
  0x84   :  { %v137_v49 = vpop.permute.xlu0 %136  ;;  %v132_v54 = vpop.permute.xlu1 %131 }
  0x8b   :  { %v105_v19 = vpop.f32.mrf.mxu0 }
  0x8c   :  { %v106_v31 = vadd.f32 %v105_v19, %v54_v29  ;;  %v216_v5 = vpop.permute.xlu0 %215  ;;  %v211_v6 = vpop.permute.xlu1 %210 }
  0x93   :  { %v108_v20 = vpop.f32.mrf.mxu0 }
  0x94   :  { %v109_v30 = vadd.f32 %v108_v20, %v59_v22  ;;  %v273_v16 = vpop.permute.xlu0 %272 }
  0x9b   :  { %v111_v23 = vpop.f32.mrf.mxu0 }
  0x9c   :  { %v112_v26 = vadd.f32 %v111_v23, %v64_v24 }
  0xa3   :  { %v114_v25 = vpop.f32.mrf.mxu0 }
  0xa4   :  { %v115_v27 = vadd.f32 %v114_v25, %v69_v21 }
  0xa6   :  { %345 = vtanh.f32 %v115_v27 }
  0xa7   :  { %347 = vtanh.f32 %v112_v26 }
  0xa8   :  { %349 = vtanh.f32 %v109_v30 }
  0xa9   :  { %351 = vtanh.f32 %v106_v31 }
  0xac   :  { %v346_v33 = vpop.eup %345 }
  0xad   :  { %174 = vmatpush.msra.mxu1 %v346_v33  ;;  %330 = vmatpush.msra.mxu3 %v346_v33  ;;  %v348_v34 = vpop.eup %347 }
  0xae   :  { %v350_v35 = vpop.eup %349 }
  0xaf   :  { %175 = vmatpush.msra.mxu1 %v348_v34  ;;  %331 = vmatpush.msra.mxu3 %v348_v34  ;;  %v352_v38 = vpop.eup %351 }
  0xb1   :  { %176 = vmatpush.msra.mxu1 %v350_v35  ;;  %332 = vmatpush.msra.mxu3 %v350_v35 }
  0xb3   :  { %177 = vmatpush.msra.mxu1 %v352_v38  ;;  %333 = vmatpush.msra.mxu3 %v352_v38 }
  0xb4   :  { %321 = vmatmul.msk.f32.vlgmr.msra.gmra.mxu1 %vm149_vm2, %v121_v36  ;;  %324 = vmatmul.msk.f32.vlgmr.msra.gmra.mxu3 %vm149_vm2, %v124_v37 }
  0xbc   :  { %322 = vmatmul.msk.f32.gmra.mxu1 %vm149_vm2, %v122_v40 }
  0xc4   :  { %323 = vmatmul.msk.f32.gmra.mxu1 %vm149_vm2, %v123_v42 }
 0x131   :  { %v179_v43 = vpop.f32.mrf.mxu1 }
 0x132   :  { %v180_v55 = vadd.f32 %v179_v43, %v132_v54 }
 0x137   :  { %v188_v45 = vpop.f32.mrf.mxu3 }
 0x138   :  { %v189_v46 = vadd.f32 %v188_v45, %v147_v44 }
 0x139   :  { %v182_v47 = vpop.f32.mrf.mxu1 }
 0x13a   :  { %353 = vtanh.f32 %v189_v46  ;;  %v183_v52 = vadd.f32 %v182_v47, %v137_v49 }
 0x140   :  { %v354_v48 = vpop.eup %353 }
 0x141   :  { %v185_v51 = vpop.f32.mrf.mxu1  ;;  %247 = vmatpush.msra.mxu2 %v354_v48  ;;  %334 = vmatpush.msrb.mxu3 %v354_v48 }
 0x142   :  { %v186_v53 = vadd.f32 %v185_v51, %v142_v50 }
 0x144   :  { %355 = vtanh.f32 %v186_v53 }
 0x145   :  { %357 = vtanh.f32 %v183_v52 }
 0x146   :  { %359 = vtanh.f32 %v180_v55 }
 0x14a   :  { %v356_v56 = vpop.eup %355 }
 0x14b   :  { %248 = vmatpush.msra.mxu2 %v356_v56  ;;  %335 = vmatpush.msrb.mxu3 %v356_v56  ;;  %v358_v57 = vpop.eup %357 }
 0x14c   :  { %v360_v60 = vpop.eup %359 }
 0x14d   :  { %249 = vmatpush.msra.mxu2 %v358_v57  ;;  %336 = vmatpush.msrb.mxu3 %v358_v57 }
 0x14f   :  { %250 = vmatpush.msra.mxu2 %v360_v60  ;;  %337 = vmatpush.msrb.mxu3 %v360_v60 }
 0x150   :  { %325 = vmatmul.msk.f32.vlgmr.msra.gmra.mxu2 %vm149_vm2, %v195_v58  ;;  %328 = vmatmul.msk.f32.vlgmr.msrb.gmra.mxu3 %vm149_vm2, %v198_v59 }
 0x158   :  { %326 = vmatmul.msk.f32.gmra.mxu2 %vm149_vm2, %v196_v61 }
 0x160   :  { %327 = vmatmul.msk.f32.gmra.mxu2 %vm149_vm2, %v197_v62 }
 0x1d3   :  { %v252_v0 = vpop.f32.mrf.mxu2  ;;  %v261_v1 = vpop.f32.mrf.mxu3 }
 0x1d4   :  { %v262_v2 = vadd.f32 %v261_v1, %v221_v63  ;;  %v253_v11 = vadd.f32 %v252_v0, %v206_v10 }
 0x1d6   :  { %361 = vtanh.f32 %v262_v2 }
 0x1db   :  { %v255_v3 = vpop.f32.mrf.mxu2 }
 0x1dc   :  { %v362_v4 = vpop.eup %361  ;;  %v256_v8 = vadd.f32 %v255_v3, %v211_v6 }
 0x1dd   :  { %290 = vmatpush.msra.mxu3 %v362_v4 }
 0x1e3   :  { %v258_v7 = vpop.f32.mrf.mxu2 }
 0x1e4   :  { %v259_v9 = vadd.f32 %v258_v7, %v216_v5 }
 0x1e6   :  { %363 = vtanh.f32 %v259_v9 }
 0x1e7   :  { %365 = vtanh.f32 %v256_v8 }
 0x1e8   :  { %367 = vtanh.f32 %v253_v11 }
 0x1ec   :  { %v364_v12 = vpop.eup %363 }
 0x1ed   :  { %291 = vmatpush.msra.mxu3 %v364_v12  ;;  %v366_v13 = vpop.eup %365 }
 0x1ee   :  { %v368_v15 = vpop.eup %367 }
 0x1ef   :  { %292 = vmatpush.msra.mxu3 %v366_v13 }
 0x1f1   :  { %293 = vmatpush.msra.mxu3 %v368_v15 }
 0x1f2   :  { %329 = vmatmul.msk.f32.vlgmr.msra.gmra.mxu3 %vm149_vm2, %v268_v14 }
 0x275   :  { %v295_v17 = vpop.f32.mrf.mxu3 }
 0x276   :  { %v296_v18 = vadd.f32 %v295_v17, %v273_v16 }
 0x278   :  { %299 = vst.msk [vmem:[#allocation3] sm:$0x3] %vm298_vm3, %v296_v18 }
 0x279   :  { %310 = dma.vmem_to_hbm [thread:$0]  %s306_s18, 32, %s308_s21, [#allocation4]  }
 0x27a   :  { %393 = dma.done.wait [#allocation4], 32  }
 0x27b   :  { %394 = vsyncadd [#allocation4], 4294967264 }
 0x27c   :  { %315 = vsyncpa [#allocation4], 1 }

</bundles_post_ra>
